<compile_context>
chip_gen: v7x
topology: tpu7x:2x2x1
jax: 0.10.0
libtpu: 0.0.40
codegen_flags: <defaults>
</compile_context>

<pallas_src>
import jax
import jax.numpy as jnp
from jax.experimental import pallas as pl
from jax.experimental.pallas import tpu as pltpu

_LANE = 128
_SMALL_N_XLA_CUTOFF = 512


def _classifier_kernel(x_ref, w_ref, b_ref, o_ref):
    # x_ref: (IN, TN), w_ref: (OUT, IN), b_ref: (OUT, 1), o_ref: (OUT, TN)
    acc = jnp.dot(w_ref[...], x_ref[...],
                  preferred_element_type=jnp.float32)           # MXU, f32 acc
    o_ref[...] = (acc + b_ref[...].astype(jnp.float32)).astype(o_ref.dtype)


def _round_up(v, m):
    return ((v + m - 1) // m) * m


def _default_tn():
    # v6e / v7x: 32 MiB scoped-VMEM default -> 16384-col tile (~18 MiB
    # double-buffered for f32) fits without touching vmem_limit_bytes.
    # v5e / unknown: stay at 8192 (~9 MiB) under the 16 MiB default.
    try:
        kind = jax.devices()[0].device_kind.lower()
    except Exception:  # pragma: no cover
        return 8192
    if ("v6" in kind) or ("v7" in kind) or ("7x" in kind):
        return 16384
    return 8192


def _pick_tile(n, tn):
    # Tiny n: a single full-width block (block == full array dim is legal for
    # any n, even when not a multiple of 128).
    if n <= 2 * _LANE:
        return n, 1
    # Lane-aligned tile, capped by the VMEM budget, but no wider than half the
    # batch so the grid has >= 2 steps (lets "parallel" shard across v7x's two
    # TensorCores and keeps the pipeline warm on v5e/v6e).
    tn_aligned = max(_LANE, (tn // _LANE) * _LANE)
    half = _round_up(pl.cdiv(n, 2), _LANE)
    tile = max(_LANE, min(tn_aligned, half))
    return tile, pl.cdiv(n, tile)


def classifier_forward(x, weight, bias, *, tn=None,
                       features_first_output=False, force_pallas=False):
    """Pallas equivalent of Classifier.forward.

    x:      (128, N) activations, features-first (f32 or bf16).
    weight: (output_size, 128), bias: (output_size,).
    Returns (N, output_size) f32 by default (PyTorch nn.Linear semantics).
    Set features_first_output=True to get the lane-dense (output_size, N) slab
    the kernel writes, skipping the extra relayout HBM pass.
    """
    in_features, n = x.shape
    out_features = weight.shape[0]
    bias_f32 = bias.astype(jnp.float32)

    # --- Small-N fast path: dispatch + pipeline overhead dominates the <1 µs
    # of useful work for toy batches, so plain XLA (or upstream fusion) wins.
    if n < _SMALL_N_XLA_CUTOFF and not force_pallas:
        out_on = (jnp.dot(weight, x, preferred_element_type=jnp.float32)
                  + bias_f32[:, None])
        return out_on if features_first_output else out_on.T

    if tn is None:
        tn = _default_tn()
    tile_n, steps = _pick_tile(n, tn)
    bias2d = bias_f32.reshape(out_features, 1)

    cost = pl.CostEstimate(
        flops=2 * out_features * in_features * n,
        transcendentals=0,
        bytes_accessed=(x.size * x.dtype.itemsize
                        + weight.size * weight.dtype.itemsize
                        + out_features * n * 4),
    )

    out_on = pl.pallas_call(
        _classifier_kernel,
        out_shape=jax.ShapeDtypeStruct((out_features, n), jnp.float32),
        grid_spec=pltpu.PrefetchScalarGridSpec(
            num_scalar_prefetch=0,
            grid=(steps,),
            in_specs=[
                # x tile marches along the batch axis (lane dim).
                pl.BlockSpec((in_features, tile_n), lambda i: (0, i)),
                # weight / bias: constant index_map -> stay VMEM-resident
                # across the whole grid (Pallas does not re-DMA them).
                pl.BlockSpec((out_features, in_features), lambda i: (0, 0)),
                pl.BlockSpec((out_features, 1), lambda i: (0, 0)),
            ],
            out_specs=pl.BlockSpec((out_features, tile_n), lambda i: (0, i)),
        ),
        compiler_params=pltpu.CompilerParams(
            dimension_semantics=("parallel",)),
        cost_estimate=cost,
    )(x, weight, bias2d)

    # PyTorch layout (N, output_size) unless the caller opts into the
    # relayout-free features-first slab.
    return out_on if features_first_output else out_on.T


if __name__ == "__main__":
    key = jax.random.PRNGKey(0)
    k_x, k_w, k_b, k_x2, k_x3 = jax.random.split(key, 5)

    in_features = 128          # fixed by nn.Linear(128, output_size)
    output_size = 16

    # Deterministic synthetic params (PyTorch Linear-style uniform init).
    bound = 1.0 / jnp.sqrt(jnp.float32(in_features))
    weight = jax.random.uniform(k_w, (output_size, in_features),
                                jnp.float32, -bound, bound)
    bias = jax.random.uniform(k_b, (output_size,), jnp.float32, -bound, bound)

    # --- 1) Toy batch (matches the module's usage): small-N XLA fast path ---
    batch = 8
    x = jax.random.normal(k_x, (in_features, batch), jnp.float32)
    ref = x.T @ weight.T + bias
    out = jax.block_until_ready(classifier_forward(x, weight, bias))
    assert out.shape == (batch, output_size)
    assert jnp.allclose(out, ref, atol=1e-5, rtol=1e-5)

    # --- 2) Same toy batch forced through the Pallas kernel (1 full block) ---
    out_k = jax.block_until_ready(
        classifier_forward(x, weight, bias, force_pallas=True))
    assert jnp.allclose(out_k, ref, atol=1e-5, rtol=1e-5)

    # --- 3) Larger ragged batch: >=2 grid steps + edge-tile path, f32 ---
    n2 = 1000
    x2 = jax.random.normal(k_x2, (in_features, n2), jnp.float32)
    out2 = jax.block_until_ready(
        classifier_forward(x2, weight, bias, force_pallas=True))
    ref2 = x2.T @ weight.T + bias
    assert out2.shape == (n2, output_size)
    assert jnp.allclose(out2, ref2, atol=1e-4, rtol=1e-4)

    # --- 4) bf16 activations/weights, features-first (no relayout pass) ---
    n3 = 1536
    x3 = jax.random.normal(k_x3, (in_features, n3), jnp.float32
                           ).astype(jnp.bfloat16)
    w_bf16 = weight.astype(jnp.bfloat16)
    out3 = jax.block_until_ready(
        classifier_forward(x3, w_bf16, bias,
                           force_pallas=True, features_first_output=True))
    ref3 = (w_bf16.astype(jnp.float32) @ x3.astype(jnp.float32)
            + bias[:, None])
    assert out3.shape == (output_size, n3)
    assert jnp.allclose(out3, ref3, atol=1e-3, rtol=1e-3)

    print("KERNEL_OK")
</pallas_src>

<mosaic_0001>
module attributes {stable_mosaic.version = 11 : i64} {
  func.func @_classifier_kernel(%arg0: i32, %arg1: memref<128x8xf32, #tpu.memory_space<vmem>>, %arg2: memref<16x128xf32, #tpu.memory_space<vmem>>, %arg3: memref<16x1xf32, #tpu.memory_space<vmem>>, %arg4: memref<16x8xf32, #tpu.memory_space<vmem>>) attributes {dimension_semantics = [#tpu.dimension_semantics<parallel>], iteration_bounds = array<i64: 1>, scalar_prefetch = 0 : i64, scratch_operands = 0 : i64, tpu.core_type = #tpu.core_type<tc>, window_params = [{transform_indices = @transform_0, window_bounds = array<i64: 128, 8>}, {pipeline_mode = #tpu.pipeline_mode<synchronous>, transform_indices = @transform_1, window_bounds = array<i64: 16, 128>}, {pipeline_mode = #tpu.pipeline_mode<synchronous>, transform_indices = @transform_2, window_bounds = array<i64: 16, 1>}, {transform_indices = @transform_3, window_bounds = array<i64: 16, 8>}]} {
    %c0 = arith.constant 0 : index
    %c0_0 = arith.constant 0 : index
    %0 = vector.load %arg2[%c0, %c0_0] : memref<16x128xf32, #tpu.memory_space<vmem>>, vector<16x128xf32>
    %c0_1 = arith.constant 0 : index
    %c0_2 = arith.constant 0 : index
    %1 = vector.load %arg1[%c0_1, %c0_2] : memref<128x8xf32, #tpu.memory_space<vmem>>, vector<128x8xf32>
    %cst = arith.constant dense<0.000000e+00> : vector<16x8xf32>
    %2 = tpu.matmul %0, %1, %cst {dimension_numbers = #tpu.dot_dimension_numbers<[1], [0], [0], [1], [0, 0, 1, 1], [], []>} : vector<16x128xf32>, vector<128x8xf32>, vector<16x8xf32> -> vector<16x8xf32>
    %c0_3 = arith.constant 0 : index
    %c0_4 = arith.constant 0 : index
    %3 = vector.load %arg3[%c0_3, %c0_4] : memref<16x1xf32, #tpu.memory_space<vmem>>, vector<16x1xf32>
    %4 = vector.broadcast %3 : vector<16x1xf32> to vector<16x8xf32>
    %5 = arith.addf %2, %4 : vector<16x8xf32>
    %c0_5 = arith.constant 0 : index
    %c0_6 = arith.constant 0 : index
    %6 = vector.load %arg4[%c0_5, %c0_6] : memref<16x8xf32, #tpu.memory_space<vmem>>, vector<16x8xf32>
    tpu.vector_store %arg4[%c0_5, %c0_6], %5 {strides = array<i32>} : memref<16x8xf32, #tpu.memory_space<vmem>>, vector<16x8xf32>,
    return
  }
  func.func @transform_0(%arg0: i32) -> (i32, i32) {
    %c0_i32 = arith.constant 0 : i32
    %c0_i32_0 = arith.constant 0 : i32
    return %c0_i32, %arg0 : i32, i32
  }
  func.func @transform_1(%arg0: i32) -> (i32, i32) {
    %c0_i32 = arith.constant 0 : i32
    %c0_i32_0 = arith.constant 0 : i32
    %c0_i32_1 = arith.constant 0 : i32
    return %c0_i32, %c0_i32_0 : i32, i32
  }
  func.func @transform_2(%arg0: i32) -> (i32, i32) {
    %c0_i32 = arith.constant 0 : i32
    %c0_i32_0 = arith.constant 0 : i32
    %c0_i32_1 = arith.constant 0 : i32
    return %c0_i32, %c0_i32_0 : i32, i32
  }
  func.func @transform_3(%arg0: i32) -> (i32, i32) {
    %c0_i32 = arith.constant 0 : i32
    %c0_i32_0 = arith.constant 0 : i32
    return %c0_i32, %arg0 : i32, i32
  }
}

</mosaic_0001>

<bundles_post_ra>
// kernel: tpu_custom_call.1
= control target key start
LH: loop header
LB: loop body
LE: loop exit
PB: predicated region body
PF: predicated region fallthrough
CT: control target
= control target key end

     0   :  { %v213_v3 = vmov 0   ;;  %vm119_vm0 = vcmask 64512   ;;  %s300_s0 = inlined_call_operand.vmem [shape: f32[128,8], index: 0, kind: input, shape index: {}]   ;;  %s301_s1 = inlined_call_operand.vmem [shape: f32[16,128], index: 1, kind: input, shape index: {}]   ;;  %s302_s2 = inlined_call_operand.vmem [shape: f32[16,1], index: 2, kind: input, shape index: {}]   ;;  %s303_s3 = inlined_call_operand.vmem [shape: f32[16,8], index: 3, kind: output, shape index: {}]  }
   0x1   :  { %v16_v0 = vld [vmem:[%s300_s0] sm:$0xff]  ;;  %v17_v1 = vld [vmem:[%s300_s0 + $0x8] sm:$0xff]  ;;  %v18_v2 = vld [vmem:[%s300_s0 + $0x10] sm:$0xff]  ;;  %212 = vset.pattern.permute.xlu0 %v213_v3 }
   0x2   :  { %v179_v4 = vpack.c.bf16 %v17_v1, %v16_v0  ;;  %v19_v5 = vld [vmem:[%s300_s0 + $0x18] sm:$0xff]  ;;  %v20_v7 = vld [vmem:[%s300_s0 + $0x20] sm:$0xff]  ;;  %v21_v8 = vld [vmem:[%s300_s0 + $0x28] sm:$0xff] }
   0x3   :  { %v183_v6 = vpack.c.bf16 %v19_v5, %v18_v2  ;;  %v187_v9 = vpack.c.bf16 %v21_v8, %v20_v7  ;;  %v14_v10 = vld [vmem:[%s301_s1] sm:$0xff]  ;;  %v22_v11 = vld [vmem:[%s300_s0 + $0x30] sm:$0xff]  ;;  %v23_v12 = vld [vmem:[%s300_s0 + $0x38] sm:$0xff] }
   0x4   :  { %180 = vmatprep.subr.bf16.mxu0 %v179_v4  ;;  %176 = vmatprep.mubr.f32.mxu0 %v14_v10  ;;  %v32_v13 = vld [vmem:[%s302_s2] sm:$0xff]  ;;  %v33_v14 = vld [vmem:[%s302_s2 + $0x8] sm:$0xff]  ;;  %v191_v15 = vpack.c.bf16 %v23_v12, %v22_v11  ;;  %v26_v19 = vld [vmem:[%s300_s0 + $0x50] sm:$0xff] }
   0x5   :  { %182 = vmatpush3.bf16.msra.mxu0 %v179_v4  ;;  %36 = vperm.xlu0 %212, %v32_v13   ;;  %v24_v16 = vld [vmem:[%s300_s0 + $0x40] sm:$0xff]  ;;  %v25_v17 = vld [vmem:[%s300_s0 + $0x48] sm:$0xff]  ;;  %v27_v20 = vld [vmem:[%s300_s0 + $0x58] sm:$0xff] }
   0x6   :  { %184 = vmatprep.subr.bf16.mxu0 %v183_v6  ;;  %v195_v18 = vpack.c.bf16 %v25_v17, %v24_v16  ;;  %v199_v21 = vpack.c.bf16 %v27_v20, %v26_v19  ;;  %v28_v22 = vld [vmem:[%s300_s0 + $0x60] sm:$0xff]  ;;  %v29_v23 = vld [vmem:[%s300_s0 + $0x68] sm:$0xff]  ;;  %v30_v25 = vld [vmem:[%s300_s0 + $0x70] sm:$0xff] }
   0x7   :  { %v203_v24 = vpack.c.bf16 %v29_v23, %v28_v22  ;;  %v31_v26 = vld [vmem:[%s300_s0 + $0x78] sm:$0xff]  ;;  %v15_v28 = vld [vmem:[%s301_s1 + $0x8] sm:$0xff] }
   0x8   :  { %v207_v27 = vpack.c.bf16 %v31_v26, %v30_v25 }
   0x9   :  { %186 = vmatpush3.bf16.msra.mxu0 %v183_v6  ;;  %41 = vperm.xlu0 %212, %v33_v14  }
   0xa   :  { %188 = vmatprep.subr.bf16.mxu0 %v187_v9 }
   0xd   :  { %190 = vmatpush3.bf16.msra.mxu0 %v187_v9 }
   0xe   :  { %192 = vmatprep.subr.bf16.mxu0 %v191_v15 }
  0x11   :  { %194 = vmatpush3.bf16.msra.mxu0 %v191_v15 }
  0x12   :  { %196 = vmatprep.subr.bf16.mxu0 %v195_v18 }
  0x15   :  { %198 = vmatpush3.bf16.msra.mxu0 %v195_v18 }
  0x16   :  { %200 = vmatprep.subr.bf16.mxu0 %v199_v21 }
  0x19   :  { %202 = vmatpush3.bf16.msra.mxu0 %v199_v21 }
  0x1a   :  { %204 = vmatprep.subr.bf16.mxu0 %v203_v24 }
  0x1d   :  { %206 = vmatpush3.bf16.msra.mxu0 %v203_v24 }
  0x1e   :  { %208 = vmatprep.subr.bf16.mxu0 %v207_v27 }
  0x21   :  { %210 = vmatpush3.bf16.msra.mxu0 %v207_v27 }
  0x24   :  { %177 = vmatmul.mubr.f32.vlgmr.msra.gmra.mrb[0].mxu0 %v15_v28 }
  0x84   :  { %v37_v29 = vpop.permute.xlu0 %36 }
  0x88   :  { %v42_v30 = vpop.permute.xlu0 %41 }
  0xf7   :  { %v178_v31 = vpop.f32.mrb[0].mxu0 }
  0xf8   :  { %v116_v32 = vadd.f32 %v178_v31, %v42_v30  ;;  %v110_v33 = vpop.f32.mrb[1].mxu0 }
  0xf9   :  { %v111_v34 = vadd.f32 %v110_v33, %v37_v29 }
  0xfa   :  { %121 = vst.msk [vmem:[%s303_s3 + $0x8] sm:$0xff] %vm119_vm0, %v116_v32 }
  0xfb   :  { %120 = vst.msk [vmem:[%s303_s3] sm:$0xff] %vm119_vm0, %v111_v34 }

</bundles_post_ra>
